<compile_context>
chip_gen: v6e
topology: v6e:2x2x1
jax: 0.10.0
libtpu: 0.0.40
codegen_flags: <defaults>
</compile_context>

<pallas_src>
import functools

import numpy as np
import jax
import jax.numpy as jnp
from jax.experimental import pallas as pl
from jax.experimental.pallas import tpu as pltpu

LANE = 128      # lane quantum (last dim)
SUBLANE = 16    # bf16 sublane quantum (second-last dim)


def _round_up(n, m):
    return ((n + m - 1) // m) * m


# ----------------------------------------------------------------------------
# MADE mask construction (mirrors MADE.update_masks with num_masks=1,
# natural_ordering=True, seed=0).  Masks returned in (in, out) layout.
# ----------------------------------------------------------------------------
def made_masks(nin, hidden_sizes, nout, seed=0, natural_ordering=True):
    rng = np.random.RandomState(seed)
    L = len(hidden_sizes)
    m = {}
    m[-1] = np.arange(nin) if natural_ordering else rng.permutation(nin)
    for l in range(L):
        m[l] = rng.randint(m[l - 1].min(), nin - 1, size=hidden_sizes[l])
    masks = [m[l - 1][:, None] <= m[l][None, :] for l in range(L)]
    masks.append(m[L - 1][:, None] < m[-1][None, :])
    if nout > nin:
        k = int(nout / nin)
        masks[-1] = np.concatenate([masks[-1]] * k, axis=1)
    return [mk.astype(np.float32) for mk in masks]


# ----------------------------------------------------------------------------
# Pallas kernel: one batch tile through the whole fused 4-layer MLP.
# Biases are folded into the padded weights (ones-lane trick), so the body is
# matmul / relu / matmul / relu / matmul / relu / matmul with f32 MXU
# accumulation and bf16 operands.
# ----------------------------------------------------------------------------
def armlp_kernel(x_ref, w1_ref, w2_ref, w3_ref, w4_ref, o_ref, *,
                 cast_before_relu):
    cdt = w1_ref.dtype  # compute dtype (bf16)

    def relu(h32):
        if cast_before_relu:
            # v6e/v7x: bf16 VPU is native; casting first halves vreg footprint.
            return jnp.maximum(h32.astype(cdt), 0)
        # v5e: no bf16 VPU -> do the max in f32, cast only for the next dot.
        return jnp.maximum(h32, 0.0).astype(cdt)

    h = relu(jnp.dot(x_ref[...], w1_ref[...], preferred_element_type=jnp.float32))
    h = relu(jnp.dot(h, w2_ref[...], preferred_element_type=jnp.float32))
    h = relu(jnp.dot(h, w3_ref[...], preferred_element_type=jnp.float32))
    o = jnp.dot(h, w4_ref[...], preferred_element_type=jnp.float32)
    o_ref[...] = o.astype(o_ref.dtype)  # bf16 store -> half the output HBM bytes


# ----------------------------------------------------------------------------
# Batch-tile selection (per review): small batch -> one tile per TensorCore;
# large batch -> 1024-row tiles so each core gets >=2 steps for DMA overlap.
# ----------------------------------------------------------------------------
def _pick_tb(batch, num_cores):
    b = _round_up(batch, SUBLANE)
    per_core = _round_up((b + num_cores - 1) // num_cores, SUBLANE)
    if per_core <= 1024:
        return per_core
    return 1024


def armlp_forward(x, aug_ws, nin, nout, *, tb=None,
                  compute_dtype=jnp.bfloat16, cast_before_relu=True,
                  num_cores=1):
    """x: (B, nin) f32.  aug_ws: 4 padded, bias-folded (aug_in, aug_out) f32 weights."""
    B = x.shape[0]
    aug_in1 = aug_ws[0].shape[0]          # layer-1 K, padded only to 16
    out_pad = aug_ws[-1].shape[1]         # 128

    if tb is None:
        tb = _pick_tb(B, num_cores)
    tb = min(_round_up(tb, SUBLANE), _round_up(B, SUBLANE))
    b_pad = _round_up(B, tb)
    grid = (b_pad // tb,)

    # Fused x_aug build: one concat (x | ones lane) + one zero pad, cast once.
    x_aug = jnp.concatenate(
        [x.astype(compute_dtype), jnp.ones((B, 1), compute_dtype)], axis=1)
    x_aug = jnp.pad(x_aug, ((0, b_pad - B), (0, aug_in1 - (nin + 1))))

    ws = [w.astype(compute_dtype) for w in aug_ws]

    in_specs = [pl.BlockSpec((tb, aug_in1), lambda i: (i, 0))]          # batch-tiled x
    in_specs += [pl.BlockSpec(w.shape, lambda i: (0, 0)) for w in ws]   # resident weights
    out_spec = pl.BlockSpec((tb, out_pad), lambda i: (i, 0))            # batch-tiled out

    kernel = functools.partial(armlp_kernel, cast_before_relu=cast_before_relu)

    out = pl.pallas_call(
        kernel,
        out_shape=jax.ShapeDtypeStruct((b_pad, out_pad), compute_dtype),
        grid_spec=pltpu.PrefetchScalarGridSpec(
            num_scalar_prefetch=0,
            grid=grid,
            in_specs=in_specs,
            out_specs=out_spec,
        ),
        compiler_params=pltpu.CompilerParams(
            # Independent batch tiles -> shard grid steps across both v7x TCs.
            dimension_semantics=("parallel",),
        ),
    )(x_aug, *ws)

    # Cast back to f32 only on the small (B, nout) slice.
    return out[:B, :nout].astype(jnp.float32)


# ----------------------------------------------------------------------------
# Parameter construction (deterministic, PyTorch-Linear-style uniform init).
# Returns the raw masked (in, out) weights/biases (for the reference) and the
# padded, bias-folded augmented weights used by the kernel.  Layer 1's input
# dim is padded only to the sublane quantum (16); all other dims to 128 lanes.
# ----------------------------------------------------------------------------
def init_armlp_params(key, nin, nh, nout):
    hidden = [nh, nh, nh]
    dims = [nin] + hidden + [nout]          # [nin, nh, nh, nh, nout]
    masks = made_masks(nin, hidden, nout)   # (in, out) per layer

    raw = []
    for i, (d_in, d_out) in enumerate(zip(dims[:-1], dims[1:])):
        key, kw, kb = jax.random.split(key, 3)
        bound = 1.0 / np.sqrt(d_in)
        w = jax.random.uniform(kw, (d_in, d_out), jnp.float32, -bound, bound)
        b = jax.random.uniform(kb, (d_out,), jnp.float32, -bound, bound)
        w = w * jnp.asarray(masks[i])       # apply autoregressive mask
        raw.append((w, b))

    aug = []
    last = len(raw) - 1
    for i, (w, b) in enumerate(raw):
        d_in, d_out = w.shape
        in_quant = SUBLANE if i == 0 else LANE     # layer-1 K only needs 16
        aug_in = _round_up(d_in + 1, in_quant)                     # +1: ones lane
        aug_out = _round_up(d_out + (0 if i == last else 1), LANE)
        wa = jnp.zeros((aug_in, aug_out), jnp.float32)
        wa = wa.at[:d_in, :d_out].set(w)
        wa = wa.at[d_in, :d_out].set(b)                            # bias row
        if i != last:
            wa = wa.at[d_in, d_out].set(1.0)                       # keep ones lane alive
        aug.append(wa)
    return raw, aug


def armlp_reference(x, raw_params, compute_dtype=jnp.float32,
                    fold_bias_dtype=None):
    """Pure-JAX reference.  compute_dtype / fold_bias_dtype mirror the kernel."""
    if fold_bias_dtype is None:
        fold_bias_dtype = compute_dtype
    h = x.astype(compute_dtype)
    n = len(raw_params)
    for i, (w, b) in enumerate(raw_params):
        h = jnp.dot(h, w.astype(compute_dtype),
                    preferred_element_type=jnp.float32)
        h = h + b.astype(fold_bias_dtype).astype(jnp.float32)
        if i < n - 1:
            h = jnp.maximum(h, 0.0).astype(compute_dtype)
    return h.astype(compute_dtype).astype(jnp.float32)


if __name__ == "__main__":
    nin, nh, nout = 8, 32, 16       # ARMLP(nin=8, nout=16, nh=32)
    batch = 512                     # small; 1 tile on single-TC, 2 tiles on v7x

    kind = jax.devices()[0].device_kind.lower()
    is_v7 = ("v7" in kind) or ("7x" in kind)
    num_cores = 2 if is_v7 else 1
    old_chip = any(v in kind for v in ("v2", "v3", "v4", "v5"))
    # bf16 matmul operands on every chip (MXU is bf16-native everywhere);
    # only the ReLU placement differs: f32 ReLU on v5e (no bf16 VPU).
    compute_dtype = jnp.bfloat16
    cast_before_relu = not old_chip

    key = jax.random.PRNGKey(0)
    key, kx = jax.random.split(key)
    x = jax.random.normal(kx, (batch, nin), jnp.float32)

    raw_params, aug_ws = init_armlp_params(key, nin, nh, nout)

    out = armlp_forward(x, aug_ws, nin, nout,
                        compute_dtype=compute_dtype,
                        cast_before_relu=cast_before_relu,
                        num_cores=num_cores)
    out = jax.block_until_ready(out)

    # Apples-to-apples check against a reference run in the same compute dtype
    # (weights, bias fold and final store all in bf16).
    ref = armlp_reference(x, raw_params, compute_dtype,
                          fold_bias_dtype=compute_dtype)
    np.testing.assert_allclose(np.asarray(out), np.asarray(ref),
                               rtol=1e-2, atol=1e-2)

    # Sanity check against exact f32 module semantics (loose: bf16 deviation
    # is a deliberate, accepted trade).
    ref32 = armlp_reference(x, raw_params, jnp.float32,
                            fold_bias_dtype=jnp.float32)
    np.testing.assert_allclose(np.asarray(out), np.asarray(ref32),
                               rtol=1e-1, atol=1e-1)

    print("KERNEL_OK")
</pallas_src>

<mosaic_0001>
module attributes {stable_mosaic.version = 11 : i64} {
  func.func @armlp_kernel(%arg0: i32, %arg1: memref<512x16xbf16, #tpu.memory_space<vmem>>, %arg2: memref<16x128xbf16, #tpu.memory_space<vmem>>, %arg3: memref<128x128xbf16, #tpu.memory_space<vmem>>, %arg4: memref<128x128xbf16, #tpu.memory_space<vmem>>, %arg5: memref<128x128xbf16, #tpu.memory_space<vmem>>, %arg6: memref<512x128xbf16, #tpu.memory_space<vmem>>) attributes {dimension_semantics = [#tpu.dimension_semantics<parallel>], iteration_bounds = array<i64: 1>, scalar_prefetch = 0 : i64, scratch_operands = 0 : i64, tpu.core_type = #tpu.core_type<tc>, window_params = [{transform_indices = @transform_0, window_bounds = array<i64: 512, 16>}, {pipeline_mode = #tpu.pipeline_mode<synchronous>, transform_indices = @transform_1, window_bounds = array<i64: 16, 128>}, {pipeline_mode = #tpu.pipeline_mode<synchronous>, transform_indices = @transform_2, window_bounds = array<i64: 128, 128>}, {pipeline_mode = #tpu.pipeline_mode<synchronous>, transform_indices = @transform_3, window_bounds = array<i64: 128, 128>}, {pipeline_mode = #tpu.pipeline_mode<synchronous>, transform_indices = @transform_4, window_bounds = array<i64: 128, 128>}, {transform_indices = @transform_5, window_bounds = array<i64: 512, 128>}]} {
    %c0 = arith.constant 0 : index
    %c0_0 = arith.constant 0 : index
    %0 = vector.load %arg1[%c0, %c0_0] : memref<512x16xbf16, #tpu.memory_space<vmem>>, vector<512x16xbf16>
    %c0_1 = arith.constant 0 : index
    %c0_2 = arith.constant 0 : index
    %1 = vector.load %arg2[%c0_1, %c0_2] : memref<16x128xbf16, #tpu.memory_space<vmem>>, vector<16x128xbf16>
    %cst = arith.constant dense<0.000000e+00> : vector<512x128xf32>
    %2 = tpu.matmul %0, %1, %cst {dimension_numbers = #tpu.dot_dimension_numbers<[1], [0], [0], [1], [0, 0, 1, 1], [], []>} : vector<512x16xbf16>, vector<16x128xbf16>, vector<512x128xf32> -> vector<512x128xf32>
    %3 = arith.truncf %2 : vector<512x128xf32> to vector<512x128xbf16>
    %cst_3 = arith.constant 0.000000e+00 : bf16
    %4 = vector.broadcast %cst_3 : bf16 to vector<512x128xbf16>
    %5 = arith.maximumf %3, %4 : vector<512x128xbf16>
    %c0_4 = arith.constant 0 : index
    %c0_5 = arith.constant 0 : index
    %6 = vector.load %arg3[%c0_4, %c0_5] : memref<128x128xbf16, #tpu.memory_space<vmem>>, vector<128x128xbf16>
    %cst_6 = arith.constant dense<0.000000e+00> : vector<512x128xf32>
    %7 = tpu.matmul %5, %6, %cst_6 {dimension_numbers = #tpu.dot_dimension_numbers<[1], [0], [0], [1], [0, 0, 1, 1], [], []>} : vector<512x128xbf16>, vector<128x128xbf16>, vector<512x128xf32> -> vector<512x128xf32>
    %8 = arith.truncf %7 : vector<512x128xf32> to vector<512x128xbf16>
    %cst_7 = arith.constant 0.000000e+00 : bf16
    %9 = vector.broadcast %cst_7 : bf16 to vector<512x128xbf16>
    %10 = arith.maximumf %8, %9 : vector<512x128xbf16>
    %c0_8 = arith.constant 0 : index
    %c0_9 = arith.constant 0 : index
    %11 = vector.load %arg4[%c0_8, %c0_9] : memref<128x128xbf16, #tpu.memory_space<vmem>>, vector<128x128xbf16>
    %cst_10 = arith.constant dense<0.000000e+00> : vector<512x128xf32>
    %12 = tpu.matmul %10, %11, %cst_10 {dimension_numbers = #tpu.dot_dimension_numbers<[1], [0], [0], [1], [0, 0, 1, 1], [], []>} : vector<512x128xbf16>, vector<128x128xbf16>, vector<512x128xf32> -> vector<512x128xf32>
    %13 = arith.truncf %12 : vector<512x128xf32> to vector<512x128xbf16>
    %cst_11 = arith.constant 0.000000e+00 : bf16
    %14 = vector.broadcast %cst_11 : bf16 to vector<512x128xbf16>
    %15 = arith.maximumf %13, %14 : vector<512x128xbf16>
    %c0_12 = arith.constant 0 : index
    %c0_13 = arith.constant 0 : index
    %16 = vector.load %arg5[%c0_12, %c0_13] : memref<128x128xbf16, #tpu.memory_space<vmem>>, vector<128x128xbf16>
    %cst_14 = arith.constant dense<0.000000e+00> : vector<512x128xf32>
    %17 = tpu.matmul %15, %16, %cst_14 {dimension_numbers = #tpu.dot_dimension_numbers<[1], [0], [0], [1], [0, 0, 1, 1], [], []>} : vector<512x128xbf16>, vector<128x128xbf16>, vector<512x128xf32> -> vector<512x128xf32>
    %18 = arith.truncf %17 : vector<512x128xf32> to vector<512x128xbf16>
    %c0_15 = arith.constant 0 : index
    %c0_16 = arith.constant 0 : index
    %19 = vector.load %arg6[%c0_15, %c0_16] : memref<512x128xbf16, #tpu.memory_space<vmem>>, vector<512x128xbf16>
    tpu.vector_store %arg6[%c0_15, %c0_16], %18 {strides = array<i32>} : memref<512x128xbf16, #tpu.memory_space<vmem>>, vector<512x128xbf16>,
    return
  }
  func.func @transform_0(%arg0: i32) -> (i32, i32) {
    %c0_i32 = arith.constant 0 : i32
    %c0_i32_0 = arith.constant 0 : i32
    return %arg0, %c0_i32 : i32, i32
  }
  func.func @transform_1(%arg0: i32) -> (i32, i32) {
    %c0_i32 = arith.constant 0 : i32
    %c0_i32_0 = arith.constant 0 : i32
    %c0_i32_1 = arith.constant 0 : i32
    return %c0_i32, %c0_i32_0 : i32, i32
  }
  func.func @transform_2(%arg0: i32) -> (i32, i32) {
    %c0_i32 = arith.constant 0 : i32
    %c0_i32_0 = arith.constant 0 : i32
    %c0_i32_1 = arith.constant 0 : i32
    return %c0_i32, %c0_i32_0 : i32, i32
  }
  func.func @transform_3(%arg0: i32) -> (i32, i32) {
    %c0_i32 = arith.constant 0 : i32
    %c0_i32_0 = arith.constant 0 : i32
    %c0_i32_1 = arith.constant 0 : i32
    return %c0_i32, %c0_i32_0 : i32, i32
  }
  func.func @transform_4(%arg0: i32) -> (i32, i32) {
    %c0_i32 = arith.constant 0 : i32
    %c0_i32_0 = arith.constant 0 : i32
    %c0_i32_1 = arith.constant 0 : i32
    return %c0_i32, %c0_i32_0 : i32, i32
  }
  func.func @transform_5(%arg0: i32) -> (i32, i32) {
    %c0_i32 = arith.constant 0 : i32
    %c0_i32_0 = arith.constant 0 : i32
    return %arg0, %c0_i32 : i32, i32
  }
}

</mosaic_0001>

<bundles_post_ra>
// kernel: tpu_custom_call.1
= control target key start
LH: loop header
LB: loop body
LE: loop exit
PB: predicated region body
PF: predicated region fallthrough
CT: control target
= control target key end

     0   :  { %vm254_vm0 = vcmask 130048   ;;  %s3529_s0 = inlined_call_operand.vmem [shape: bf16[512,16], index: 0, kind: input, shape index: {}]   ;;  %s3530_s1 = inlined_call_operand.vmem [shape: bf16[16,128], index: 1, kind: input, shape index: {}]   ;;  %s3531_s2 = inlined_call_operand.vmem [shape: bf16[128,128], index: 2, kind: input, shape index: {}]   ;;  %s3532_s3 = inlined_call_operand.vmem [shape: bf16[128,128], index: 3, kind: input, shape index: {}]   ;;  %s3533_s4 = inlined_call_operand.vmem [shape: bf16[128,128], index: 4, kind: input, shape index: {}]   ;;  %s3534_s5 = inlined_call_operand.hbm [shape: bf16[512,128], index: 5, kind: output, shape index: {}]  }
   0x1   :  { %v3114_v0 = vld [vmem:[%s3530_s1] sm:$0xff]   ;;  %v3116_v2 = vld [vmem:[%s3529_s0 + $0x8] sm:$0xff]   ;;  %v3117_v3 = vld [vmem:[%s3529_s0 + $0x10] sm:$0xff]  }
   0x2   :  { %v3115_v1 = vld [vmem:[%s3529_s0] sm:$0xff]   ;;  %2788 = vmatprep.subr.bf16.mxu0 %v3114_v0  ;;  %v3118_v4 = vld [vmem:[%s3529_s0 + $0x18] sm:$0xff]   ;;  %v3120_v6 = vld [vmem:[%s3529_s0 + $0x28] sm:$0xff]  }
   0x3   :  { %2789 = vmatpush3.bf16.msra.mxu0 %v3114_v0  ;;  %2790 = vmatprep.mubr.msk.bf16.mxu0 %vm254_vm0, %v3115_v1  ;;  %v3119_v5 = vld [vmem:[%s3529_s0 + $0x20] sm:$0xff]   ;;  %v3121_v7 = vld [vmem:[%s3529_s0 + $0x30] sm:$0xff]   ;;  %v3122_v8 = vld [vmem:[%s3529_s0 + $0x38] sm:$0xff]  }
   0x4   :  { %v3123_v9 = vld [vmem:[%s3529_s0 + $0x40] sm:$0xff]   ;;  %v3124_v10 = vld [vmem:[%s3529_s0 + $0x48] sm:$0xff]   ;;  %v3147_v11 = vld [vmem:[%s3531_s2 + $0x38] sm:$0xff]  }
   0x5   :  { %v3148_v12 = vld [vmem:[%s3531_s2 + $0x30] sm:$0xff]   ;;  %2854 = vmatprep.subr.bf16.mxu1 %v3147_v11  ;;  %v3149_v14 = vld [vmem:[%s3531_s2 + $0x28] sm:$0xff]   ;;  %v3150_v15 = vld [vmem:[%s3531_s2 + $0x20] sm:$0xff]  }
   0x6   :  { %2791 = vmatmul.mubr.msk.bf16.vlgmr.msra.gmra.mxu0 %vm254_vm0, %v3116_v2  ;;  %v3125_v13 = vld [vmem:[%s3529_s0 + $0x50] sm:$0xff]   ;;  %2855 = vmatpush3.bf16.msra.mxu1 %v3147_v11  ;;  %v3126_v16 = vld [vmem:[%s3529_s0 + $0x58] sm:$0xff]   ;;  %v3127_v17 = vld [vmem:[%s3529_s0 + $0x60] sm:$0xff]  }
   0x7   :  { %2794 = vmatprep.mubr.msk.bf16.mxu0 %vm254_vm0, %v3117_v3  ;;  %2856 = vmatprep.subr.bf16.mxu1 %v3148_v12  ;;  %v3151_v18 = vld [vmem:[%s3531_s2 + $0x18] sm:$0xff]   ;;  %v3128_v19 = vld [vmem:[%s3529_s0 + $0x68] sm:$0xff]  }
   0xa   :  { %2857 = vmatpush3.bf16.msra.mxu1 %v3148_v12 }
   0xb   :  { %2858 = vmatprep.subr.bf16.mxu1 %v3149_v14 }
   0xe   :  { %2795 = vmatmul.mubr.msk.bf16.gmra.mxu0 %vm254_vm0, %v3118_v4  ;;  %2859 = vmatpush3.bf16.msra.mxu1 %v3149_v14 }
   0xf   :  { %2798 = vmatprep.mubr.msk.bf16.mxu0 %vm254_vm0, %v3119_v5  ;;  %2860 = vmatprep.subr.bf16.mxu1 %v3150_v15 }
  0x12   :  { %2861 = vmatpush3.bf16.msra.mxu1 %v3150_v15 }
  0x13   :  { %2862 = vmatprep.subr.bf16.mxu1 %v3151_v18 }
  0x16   :  { %2799 = vmatmul.mubr.msk.bf16.gmra.mxu0 %vm254_vm0, %v3120_v6 }
  0x17   :  { %2802 = vmatprep.mubr.msk.bf16.mxu0 %vm254_vm0, %v3121_v7 }
  0x1e   :  { %2803 = vmatmul.mubr.msk.bf16.gmra.mxu0 %vm254_vm0, %v3122_v8 }
  0x1f   :  { %2806 = vmatprep.mubr.msk.bf16.mxu0 %vm254_vm0, %v3123_v9 }
  0x26   :  { %2807 = vmatmul.mubr.msk.bf16.gmra.mxu0 %vm254_vm0, %v3124_v10 }
  0x27   :  { %2810 = vmatprep.mubr.msk.bf16.mxu0 %vm254_vm0, %v3125_v13 }
  0x2e   :  { %2811 = vmatmul.mubr.msk.bf16.gmra.mxu0 %vm254_vm0, %v3126_v16 }
  0x2f   :  { %2814 = vmatprep.mubr.msk.bf16.mxu0 %vm254_vm0, %v3127_v17 }
  0x30   :  { %10 = vsyncpa [#allocation3], 0  ;;  %v3129_v20 = vld [vmem:[%s3529_s0 + $0x70] sm:$0xff]   ;;  %2863 = vmatpush3.bf16.msra.mxu1 %v3151_v18  ;;  %v3130_v21 = vld [vmem:[%s3529_s0 + $0x78] sm:$0xff]   ;;  %v3193_v54 = vmov 0  }
  0x31   :  { %v3131_v22 = vld [vmem:[%s3529_s0 + $0x80] sm:$0xff]   ;;  %v3132_v23 = vld [vmem:[%s3529_s0 + $0x88] sm:$0xff]   ;;  %v3133_v24 = vld [vmem:[%s3529_s0 + $0x90] sm:$0xff]  }
  0x32   :  { %v3152_v25 = vld [vmem:[%s3531_s2 + $0x10] sm:$0xff]   ;;  %v3153_v26 = vld [vmem:[%s3531_s2 + $0x8] sm:$0xff]   ;;  %v3134_v27 = vld [vmem:[%s3529_s0 + $0x98] sm:$0xff]  }
  0x33   :  { %2864 = vmatprep.subr.bf16.mxu1 %v3152_v25  ;;  %v3135_v28 = vld [vmem:[%s3529_s0 + $0xa0] sm:$0xff]   ;;  %v3136_v30 = vld [vmem:[%s3529_s0 + $0xa8] sm:$0xff]   ;;  %v3137_v31 = vld [vmem:[%s3529_s0 + $0xb0] sm:$0xff]  }
  0x34   :  { %2865 = vmatpush3.bf16.msra.mxu1 %v3152_v25  ;;  %v3154_v29 = vld [vmem:[%s3531_s2] sm:$0xff]   ;;  %v3138_v32 = vld [vmem:[%s3529_s0 + $0xb8] sm:$0xff]   ;;  %v3140_v34 = vld [vmem:[%s3529_s0 + $0xc8] sm:$0xff]  }
  0x35   :  { %2866 = vmatprep.subr.bf16.mxu1 %v3153_v26  ;;  %v3139_v33 = vld [vmem:[%s3529_s0 + $0xc0] sm:$0xff]   ;;  %v3141_v35 = vld [vmem:[%s3529_s0 + $0xd0] sm:$0xff]   ;;  %v3142_v36 = vld [vmem:[%s3529_s0 + $0xd8] sm:$0xff]  }
  0x36   :  { %2815 = vmatmul.mubr.msk.bf16.gmra.mxu0 %vm254_vm0, %v3128_v19  ;;  %v3143_v37 = vld [vmem:[%s3529_s0 + $0xe0] sm:$0xff]   ;;  %v3144_v38 = vld [vmem:[%s3529_s0 + $0xe8] sm:$0xff]   ;;  %v3145_v39 = vld [vmem:[%s3529_s0 + $0xf0] sm:$0xff]  }
  0x37   :  { %2818 = vmatprep.mubr.msk.bf16.mxu0 %vm254_vm0, %v3129_v20  ;;  %v3146_v40 = vld [vmem:[%s3529_s0 + $0xf8] sm:$0xff]   ;;  %v3156_v42 = vld [vmem:[%s3532_s3 + $0x30] sm:$0xff]   ;;  %v3157_v43 = vld [vmem:[%s3532_s3 + $0x28] sm:$0xff]  }
  0x38   :  { %2867 = vmatpush3.bf16.msra.mxu1 %v3153_v26  ;;  %v3155_v41 = vld [vmem:[%s3532_s3 + $0x38] sm:$0xff]   ;;  %v3158_v47 = vld [vmem:[%s3532_s3 + $0x20] sm:$0xff]   ;;  %v3160_v53 = vld [vmem:[%s3532_s3 + $0x10] sm:$0xff]  }
  0x39   :  { %2868 = vmatprep.subr.bf16.mxu1 %v3154_v29  ;;  %2934 = vmatprep.subr.bf16.mxu0 %v3155_v41  ;;  %v3159_v48 = vld [vmem:[%s3532_s3 + $0x18] sm:$0xff]   ;;  %v3161_v59 = vld [vmem:[%s3532_s3 + $0x8] sm:$0xff]   ;;  %v3162_v0 = vld [vmem:[%s3532_s3] sm:$0xff]  }
  0x3a   :  { %2935 = vmatpush3.bf16.msra.mxu0 %v3155_v41 }
  0x3b   :  { %2936 = vmatprep.subr.bf16.mxu0 %v3156_v42 }
  0x3c   :  { %2869 = vmatpush3.bf16.msra.mxu1 %v3154_v29 }
  0x3e   :  { %2819 = vmatmul.mubr.msk.bf16.gmra.mxu0 %vm254_vm0, %v3130_v21 }
  0x3f   :  { %2822 = vmatprep.mubr.msk.bf16.mxu0 %vm254_vm0, %v3131_v22  ;;  %2937 = vmatpush3.bf16.msra.mxu0 %v3156_v42 }
  0x40   :  { %2938 = vmatprep.subr.bf16.mxu0 %v3157_v43 }
  0x43   :  { %2939 = vmatpush3.bf16.msra.mxu0 %v3157_v43 }
  0x44   :  { %2940 = vmatprep.subr.bf16.mxu0 %v3158_v47 }
  0x46   :  { %2823 = vmatmul.mubr.msk.bf16.gmra.mxu0 %vm254_vm0, %v3132_v23 }
  0x47   :  { %2826 = vmatprep.mubr.msk.bf16.mxu0 %vm254_vm0, %v3133_v24  ;;  %2941 = vmatpush3.bf16.msra.mxu0 %v3158_v47 }
  0x48   :  { %2942 = vmatprep.subr.bf16.mxu0 %v3159_v48 }
  0x4b   :  { %2943 = vmatpush3.bf16.msra.mxu0 %v3159_v48 }
  0x4c   :  { %2944 = vmatprep.subr.bf16.mxu0 %v3160_v53 }
  0x4e   :  { %2827 = vmatmul.mubr.msk.bf16.gmra.mxu0 %vm254_vm0, %v3134_v27 }
  0x4f   :  { %2830 = vmatprep.mubr.msk.bf16.mxu0 %vm254_vm0, %v3135_v28  ;;  %2945 = vmatpush3.bf16.msra.mxu0 %v3160_v53 }
  0x50   :  { %2946 = vmatprep.subr.bf16.mxu0 %v3161_v59 }
  0x53   :  { %2947 = vmatpush3.bf16.msra.mxu0 %v3161_v59 }
  0x54   :  { %2948 = vmatprep.subr.bf16.mxu0 %v3162_v0 }
  0x56   :  { %2831 = vmatmul.mubr.msk.bf16.gmra.mxu0 %vm254_vm0, %v3136_v30 }
  0x57   :  { %2834 = vmatprep.mubr.msk.bf16.mxu0 %vm254_vm0, %v3137_v31  ;;  %2949 = vmatpush3.bf16.msra.mxu0 %v3162_v0 }
  0x5e   :  { %2835 = vmatmul.mubr.msk.bf16.gmra.mxu0 %vm254_vm0, %v3138_v32 }
  0x5f   :  { %2838 = vmatprep.mubr.msk.bf16.mxu0 %vm254_vm0, %v3139_v33 }
  0x66   :  { %2839 = vmatmul.mubr.msk.bf16.gmra.mxu0 %vm254_vm0, %v3140_v34 }
  0x67   :  { %2842 = vmatprep.mubr.msk.bf16.mxu0 %vm254_vm0, %v3141_v35 }
  0x6e   :  { %2843 = vmatmul.mubr.msk.bf16.gmra.mxu0 %vm254_vm0, %v3142_v36 }
  0x6f   :  { %2846 = vmatprep.mubr.msk.bf16.mxu0 %vm254_vm0, %v3143_v37 }
  0x76   :  { %2847 = vmatmul.mubr.msk.bf16.gmra.mxu0 %vm254_vm0, %v3144_v38 }
  0x77   :  { %2850 = vmatprep.mubr.msk.bf16.mxu0 %vm254_vm0, %v3145_v39 }
  0x7e   :  { %2851 = vmatmul.mubr.msk.bf16.gmra.mxu0 %vm254_vm0, %v3146_v40 }
  0xc6   :  { %v2792_v44 = vpop.f32.mrf.mxu0 }
  0xc8   :  { %v385_v45 = vpop.f32.mrf.mxu0 }
  0xca   :  { %v2793_v46 = vpop.f32.mrf.mxu0 }
  0xcb   :  { %v641_v49 = vpack.c.bf16 %v2793_v46, %v2792_v44 }
  0xcc   :  { %v388_v50 = vpop.f32.mrf.mxu0 }
  0xcd   :  { %v640_v51 = vpack.c.bf16 %v388_v50, %v385_v45  ;;  %v673_v56 = vmax.bf16 %v3193_v54, %v641_v49 }
  0xce   :  { %v2796_v52 = vpop.f32.mrf.mxu0 }
  0xcf   :  { %v672_v55 = vmax.bf16 %v3193_v54, %v640_v51 }
  0xd0   :  { %v401_v57 = vpop.f32.mrf.mxu0 }
  0xd1   :  { %2870 = vmatprep.mubr.bf16.mxu1 %v672_v55 }
  0xd2   :  { %v2797_v58 = vpop.f32.mrf.mxu0  ;;  %2871 = vmatmul.mubr.bf16.vlgmr.msra.gmra.mxu1 %v673_v56 }
  0xd3   :  { %v643_v60 = vpack.c.bf16 %v2797_v58, %v2796_v52 }
  0xd4   :  { %v404_v61 = vpop.f32.mrf.mxu0 }
  0xd5   :  { %v642_v62 = vpack.c.bf16 %v404_v61, %v401_v57  ;;  %v675_v2 = vmax.bf16 %v3193_v54, %v643_v60 }
  0xd6   :  { %v2800_v63 = vpop.f32.mrf.mxu0 }
  0xd7   :  { %v674_v1 = vmax.bf16 %v3193_v54, %v642_v62 }
  0xd8   :  { %v417_v3 = vpop.f32.mrf.mxu0 }
  0xd9   :  { %2874 = vmatprep.mubr.bf16.mxu1 %v674_v1 }
  0xda   :  { %v2801_v4 = vpop.f32.mrf.mxu0  ;;  %2875 = vmatmul.mubr.bf16.gmra.mxu1 %v675_v2 }
  0xdb   :  { %v645_v5 = vpack.c.bf16 %v2801_v4, %v2800_v63 }
  0xdc   :  { %v420_v6 = vpop.f32.mrf.mxu0 }
  0xdd   :  { %v644_v7 = vpack.c.bf16 %v420_v6, %v417_v3  ;;  %v677_v10 = vmax.bf16 %v3193_v54, %v645_v5 }
  0xde   :  { %v2804_v8 = vpop.f32.mrf.mxu0 }
  0xdf   :  { %v676_v9 = vmax.bf16 %v3193_v54, %v644_v7 }
  0xe0   :  { %v433_v11 = vpop.f32.mrf.mxu0 }
  0xe1   :  { %2878 = vmatprep.mubr.bf16.mxu1 %v676_v9 }
  0xe2   :  { %v2805_v12 = vpop.f32.mrf.mxu0  ;;  %2879 = vmatmul.mubr.bf16.gmra.mxu1 %v677_v10 }
  0xe3   :  { %v647_v13 = vpack.c.bf16 %v2805_v12, %v2804_v8 }
  0xe4   :  { %v436_v14 = vpop.f32.mrf.mxu0 }
  0xe5   :  { %v646_v15 = vpack.c.bf16 %v436_v14, %v433_v11  ;;  %v679_v18 = vmax.bf16 %v3193_v54, %v647_v13 }
  0xe6   :  { %v2808_v16 = vpop.f32.mrf.mxu0 }
  0xe7   :  { %v678_v17 = vmax.bf16 %v3193_v54, %v646_v15 }
  0xe8   :  { %v449_v19 = vpop.f32.mrf.mxu0 }
  0xe9   :  { %2882 = vmatprep.mubr.bf16.mxu1 %v678_v17 }
  0xea   :  { %v2809_v20 = vpop.f32.mrf.mxu0  ;;  %2883 = vmatmul.mubr.bf16.gmra.mxu1 %v679_v18 }
  0xeb   :  { %v649_v21 = vpack.c.bf16 %v2809_v20, %v2808_v16 }
  0xec   :  { %v452_v22 = vpop.f32.mrf.mxu0 }
  0xed   :  { %v648_v23 = vpack.c.bf16 %v452_v22, %v449_v19  ;;  %v681_v26 = vmax.bf16 %v3193_v54, %v649_v21 }
  0xee   :  { %v2812_v24 = vpop.f32.mrf.mxu0 }
  0xef   :  { %v680_v25 = vmax.bf16 %v3193_v54, %v648_v23 }
  0xf0   :  { %v465_v27 = vpop.f32.mrf.mxu0 }
  0xf1   :  { %2886 = vmatprep.mubr.bf16.mxu1 %v680_v25 }
  0xf2   :  { %v2813_v28 = vpop.f32.mrf.mxu0  ;;  %2887 = vmatmul.mubr.bf16.gmra.mxu1 %v681_v26 }
  0xf3   :  { %v651_v29 = vpack.c.bf16 %v2813_v28, %v2812_v24 }
  0xf4   :  { %v468_v30 = vpop.f32.mrf.mxu0 }
  0xf5   :  { %v650_v31 = vpack.c.bf16 %v468_v30, %v465_v27  ;;  %v683_v34 = vmax.bf16 %v3193_v54, %v651_v29 }
  0xf6   :  { %v2816_v32 = vpop.f32.mrf.mxu0 }
  0xf7   :  { %v682_v33 = vmax.bf16 %v3193_v54, %v650_v31 }
  0xf8   :  { %v481_v35 = vpop.f32.mrf.mxu0 }
  0xf9   :  { %2890 = vmatprep.mubr.bf16.mxu1 %v682_v33 }
  0xfa   :  { %v2817_v36 = vpop.f32.mrf.mxu0  ;;  %2891 = vmatmul.mubr.bf16.gmra.mxu1 %v683_v34 }
  0xfb   :  { %v653_v37 = vpack.c.bf16 %v2817_v36, %v2816_v32 }
  0xfc   :  { %v484_v38 = vpop.f32.mrf.mxu0 }
  0xfd   :  { %v652_v39 = vpack.c.bf16 %v484_v38, %v481_v35  ;;  %v685_v42 = vmax.bf16 %v3193_v54, %v653_v37 }
  0xfe   :  { %v2820_v40 = vpop.f32.mrf.mxu0 }
  0xff   :  { %v684_v41 = vmax.bf16 %v3193_v54, %v652_v39 }
 0x100   :  { %v497_v43 = vpop.f32.mrf.mxu0 }
 0x101   :  { %2894 = vmatprep.mubr.bf16.mxu1 %v684_v41 }
 0x102   :  { %v2821_v44 = vpop.f32.mrf.mxu0  ;;  %2895 = vmatmul.mubr.bf16.gmra.mxu1 %v685_v42 }
 0x103   :  { %v655_v45 = vpack.c.bf16 %v2821_v44, %v2820_v40 }
 0x104   :  { %v500_v46 = vpop.f32.mrf.mxu0 }
 0x105   :  { %v654_v47 = vpack.c.bf16 %v500_v46, %v497_v43  ;;  %v687_v50 = vmax.bf16 %v3193_v54, %v655_v45 }
 0x106   :  { %v2824_v48 = vpop.f32.mrf.mxu0 }
 0x107   :  { %v686_v49 = vmax.bf16 %v3193_v54, %v654_v47 }
 0x108   :  { %v513_v51 = vpop.f32.mrf.mxu0 }
 0x109   :  { %2898 = vmatprep.mubr.bf16.mxu1 %v686_v49 }
 0x10a   :  { %v2825_v52 = vpop.f32.mrf.mxu0  ;;  %2899 = vmatmul.mubr.bf16.gmra.mxu1 %v687_v50 }
 0x10b   :  { %v657_v53 = vpack.c.bf16 %v2825_v52, %v2824_v48  ;;  %v3164_v52 = vld [vmem:[%s3533_s4 + $0x30] sm:$0xff]  }
 0x10c   :  { %v516_v55 = vpop.f32.mrf.mxu0 }
 0x10d   :  { %v656_v56 = vpack.c.bf16 %v516_v55, %v513_v51  ;;  %v689_v59 = vmax.bf16 %v3193_v54, %v657_v53  ;;  %v3163_v51 = vld [vmem:[%s3533_s4 + $0x38] sm:$0xff]   ;;  %v3165_v55 = vld [vmem:[%s3533_s4 + $0x28] sm:$0xff]  }
 0x10e   :  { %v2828_v57 = vpop.f32.mrf.mxu0  ;;  %3094 = vmatprep.subr.bf16.mxu1 %v3163_v51  ;;  %3014 = vmatprep.subr.bf16.mxu0 %v3163_v51 }
 0x10f   :  { %v688_v58 = vmax.bf16 %v3193_v54, %v656_v56  ;;  %3102 = vmatpush3.bf16.msra.mxu1 %v3163_v51 }
 0x110   :  { %v529_v60 = vpop.f32.mrf.mxu0  ;;  %3095 = vmatprep.subr.bf16.mxu1 %v3164_v52 }
 0x111   :  { %2902 = vmatprep.mubr.bf16.mxu1 %v688_v58  ;;  %v3166_v58 = vld [vmem:[%s3533_s4 + $0x20] sm:$0xff]  }
 0x112   :  { %v2829_v61 = vpop.f32.mrf.mxu0  ;;  %2903 = vmatmul.mubr.bf16.gmra.mxu1 %v689_v59 }
 0x113   :  { %v659_v62 = vpack.c.bf16 %v2829_v61, %v2828_v57  ;;  %3103 = vmatpush3.bf16.msra.mxu1 %v3164_v52 }
 0x114   :  { %v532_v63 = vpop.f32.mrf.mxu0  ;;  %3096 = vmatprep.subr.bf16.mxu1 %v3165_v55 }
 0x115   :  { %v658_v0 = vpack.c.bf16 %v532_v63, %v529_v60  ;;  %v691_v3 = vmax.bf16 %v3193_v54, %v659_v62  ;;  %v3167_v62 = vld [vmem:[%s3533_s4 + $0x18] sm:$0xff]  }
 0x116   :  { %v2832_v1 = vpop.f32.mrf.mxu0 }
 0x117   :  { %v690_v2 = vmax.bf16 %v3193_v54, %v658_v0  ;;  %3104 = vmatpush3.bf16.msra.mxu1 %v3165_v55 }
 0x118   :  { %v545_v4 = vpop.f32.mrf.mxu0  ;;  %3097 = vmatprep.subr.bf16.mxu1 %v3166_v58 }
 0x119   :  { %2906 = vmatprep.mubr.bf16.mxu1 %v690_v2 }
 0x11a   :  { %v2833_v5 = vpop.f32.mrf.mxu0  ;;  %2907 = vmatmul.mubr.bf16.gmra.mxu1 %v691_v3  ;;  %v3168_v3 = vld [vmem:[%s3533_s4 + $0x10] sm:$0xff]  }
 0x11b   :  { %v661_v6 = vpack.c.bf16 %v2833_v5, %v2832_v1  ;;  %3105 = vmatpush3.bf16.msra.mxu1 %v3166_v58 }
 0x11c   :  { %v548_v7 = vpop.f32.mrf.mxu0  ;;  %3098 = vmatprep.subr.bf16.mxu1 %v3167_v62 }
 0x11d   :  { %v660_v8 = vpack.c.bf16 %v548_v7, %v545_v4  ;;  %v693_v11 = vmax.bf16 %v3193_v54, %v661_v6 }
 0x11e   :  { %v2836_v9 = vpop.f32.mrf.mxu0 }
 0x11f   :  { %v692_v10 = vmax.bf16 %v3193_v54, %v660_v8  ;;  %3106 = vmatpush3.bf16.msra.mxu1 %v3167_v62  ;;  %v3169_v8 = vld [vmem:[%s3533_s4 + $0x8] sm:$0xff]  }
 0x120   :  { %v561_v12 = vpop.f32.mrf.mxu0  ;;  %3099 = vmatprep.subr.bf16.mxu1 %v3168_v3 }
 0x121   :  { %2910 = vmatprep.mubr.bf16.mxu1 %v692_v10 }
 0x122   :  { %v2837_v13 = vpop.f32.mrf.mxu0  ;;  %2911 = vmatmul.mubr.bf16.gmra.mxu1 %v693_v11 }
 0x123   :  { %v663_v14 = vpack.c.bf16 %v2837_v13, %v2836_v9  ;;  %3107 = vmatpush3.bf16.msra.mxu1 %v3168_v3 }
 0x124   :  { %v564_v15 = vpop.f32.mrf.mxu0  ;;  %3100 = vmatprep.subr.bf16.mxu1 %v3169_v8 }
 0x125   :  { %v662_v16 = vpack.c.bf16 %v564_v15, %v561_v12  ;;  %v695_v19 = vmax.bf16 %v3193_v54, %v663_v14 }
 0x126   :  { %v2840_v17 = vpop.f32.mrf.mxu0 }
 0x127   :  { %v694_v18 = vmax.bf16 %v3193_v54, %v662_v16  ;;  %3108 = vmatpush3.bf16.msra.mxu1 %v3169_v8 }
 0x128   :  { %v577_v20 = vpop.f32.mrf.mxu0 }
 0x129   :  { %2914 = vmatprep.mubr.bf16.mxu1 %v694_v18 }
 0x12a   :  { %v2841_v21 = vpop.f32.mrf.mxu0  ;;  %2915 = vmatmul.mubr.bf16.gmra.mxu1 %v695_v19 }
 0x12b   :  { %v665_v22 = vpack.c.bf16 %v2841_v21, %v2840_v17 }
 0x12c   :  { %v580_v23 = vpop.f32.mrf.mxu0 }
 0x12d   :  { %v664_v24 = vpack.c.bf16 %v580_v23, %v577_v20  ;;  %v697_v27 = vmax.bf16 %v3193_v54, %v665_v22 }
 0x12e   :  { %v2844_v25 = vpop.f32.mrf.mxu0 }
 0x12f   :  { %v696_v26 = vmax.bf16 %v3193_v54, %v664_v24 }
 0x130   :  { %v593_v28 = vpop.f32.mrf.mxu0 }
 0x131   :  { %2918 = vmatprep.mubr.bf16.mxu1 %v696_v26 }
 0x132   :  { %v2845_v29 = vpop.f32.mrf.mxu0  ;;  %2919 = vmatmul.mubr.bf16.gmra.mxu1 %v697_v27 }
 0x133   :  { %v667_v30 = vpack.c.bf16 %v2845_v29, %v2844_v25 }
 0x134   :  { %v596_v31 = vpop.f32.mrf.mxu0 }
 0x135   :  { %v666_v32 = vpack.c.bf16 %v596_v31, %v593_v28  ;;  %v699_v35 = vmax.bf16 %v3193_v54, %v667_v30 }
 0x136   :  { %v2848_v33 = vpop.f32.mrf.mxu0 }
 0x137   :  { %v698_v34 = vmax.bf16 %v3193_v54, %v666_v32 }
 0x138   :  { %v609_v36 = vpop.f32.mrf.mxu0 }
 0x139   :  { %2922 = vmatprep.mubr.bf16.mxu1 %v698_v34 }
 0x13a   :  { %v2849_v37 = vpop.f32.mrf.mxu0  ;;  %2923 = vmatmul.mubr.bf16.gmra.mxu1 %v699_v35 }
 0x13b   :  { %v669_v38 = vpack.c.bf16 %v2849_v37, %v2848_v33 }
 0x13c   :  { %v612_v39 = vpop.f32.mrf.mxu0 }
 0x13d   :  { %v668_v40 = vpack.c.bf16 %v612_v39, %v609_v36  ;;  %v701_v43 = vmax.bf16 %v3193_v54, %v669_v38 }
 0x13e   :  { %v2852_v41 = vpop.f32.mrf.mxu0 }
 0x13f   :  { %v700_v42 = vmax.bf16 %v3193_v54, %v668_v40 }
 0x140   :  { %v625_v44 = vpop.f32.mrf.mxu0 }
 0x141   :  { %2926 = vmatprep.mubr.bf16.mxu1 %v700_v42 }
 0x142   :  { %v2853_v45 = vpop.f32.mrf.mxu0  ;;  %2927 = vmatmul.mubr.bf16.gmra.mxu1 %v701_v43 }
 0x143   :  { %v671_v46 = vpack.c.bf16 %v2853_v45, %v2852_v41 }
 0x144   :  { %v628_v47 = vpop.f32.mrf.mxu0 }
 0x145   :  { %v670_v48 = vpack.c.bf16 %v628_v47, %v625_v44  ;;  %v703_v50 = vmax.bf16 %v3193_v54, %v671_v46 }
 0x147   :  { %v702_v49 = vmax.bf16 %v3193_v54, %v670_v48 }
 0x149   :  { %2930 = vmatprep.mubr.bf16.mxu1 %v702_v49 }
 0x14a   :  { %2931 = vmatmul.mubr.bf16.gmra.mxu1 %v703_v50 }
 0x192   :  { %v2872_v53 = vpop.f32.mrf.mxu1 }
 0x194   :  { %v802_v56 = vpop.f32.mrf.mxu1 }
 0x196   :  { %v2873_v57 = vpop.f32.mrf.mxu1 }
 0x197   :  { %v1058_v59 = vpack.c.bf16 %v2873_v57, %v2872_v53 }
 0x198   :  { %v805_v60 = vpop.f32.mrf.mxu1 }
 0x199   :  { %v1057_v61 = vpack.c.bf16 %v805_v60, %v802_v56  ;;  %v1090_v1 = vmax.bf16 %v3193_v54, %v1058_v59 }
 0x19a   :  { %v2876_v63 = vpop.f32.mrf.mxu1 }
 0x19b   :  { %v1089_v0 = vmax.bf16 %v3193_v54, %v1057_v61 }
 0x19c   :  { %v818_v2 = vpop.f32.mrf.mxu1 }
 0x19d   :  { %2950 = vmatprep.mubr.bf16.mxu0 %v1089_v0 }
 0x19e   :  { %v2877_v4 = vpop.f32.mrf.mxu1  ;;  %2951 = vmatmul.mubr.bf16.vlgmr.msra.gmra.mxu0 %v1090_v1 }
 0x19f   :  { %3015 = vmatpush3.bf16.msra.mxu0 %v3163_v51  ;;  %v1060_v5 = vpack.c.bf16 %v2877_v4, %v2876_v63 }
 0x1a0   :  { %v821_v6 = vpop.f32.mrf.mxu1  ;;  %3016 = vmatprep.subr.bf16.mxu0 %v3164_v52 }
 0x1a1   :  { %v1059_v7 = vpack.c.bf16 %v821_v6, %v818_v2  ;;  %v1092_v11 = vmax.bf16 %v3193_v54, %v1060_v5 }
 0x1a2   :  { %v2880_v9 = vpop.f32.mrf.mxu1 }
 0x1a3   :  { %v1091_v10 = vmax.bf16 %v3193_v54, %v1059_v7  ;;  %3017 = vmatpush3.bf16.msra.mxu0 %v3164_v52 }
 0x1a4   :  { %v834_v12 = vpop.f32.mrf.mxu1  ;;  %3018 = vmatprep.subr.bf16.mxu0 %v3165_v55 }
 0x1a5   :  { %2954 = vmatprep.mubr.bf16.mxu0 %v1091_v10 }
 0x1a6   :  { %v2881_v13 = vpop.f32.mrf.mxu1  ;;  %2955 = vmatmul.mubr.bf16.gmra.mxu0 %v1092_v11 }
 0x1a7   :  { %3019 = vmatpush3.bf16.msra.mxu0 %v3165_v55  ;;  %v1062_v14 = vpack.c.bf16 %v2881_v13, %v2880_v9  ;;  %v3170_v9 = vld [vmem:[%s3533_s4] sm:$0xff]   ;;  %s3194_s4 = smov [#allocation2]  }
 0x1a8   :  { %v837_v15 = vpop.f32.mrf.mxu1  ;;  %3020 = vmatprep.subr.bf16.mxu0 %v3166_v58  ;;  %3101 = vmatprep.subr.bf16.mxu1 %v3170_v9  ;;  %s2216_s24 = sshll.u32 %s3194_s4, 4  ;;  %s2217_s24 = int_to_ptr.vmem [resolvable:$true] %s2216_s24 }
 0x1a9   :  { %v1061_v16 = vpack.c.bf16 %v837_v15, %v834_v12  ;;  %v1094_v19 = vmax.bf16 %v3193_v54, %v1062_v14  ;;  %3109 = vmatpush3.bf16.msra.mxu1 %v3170_v9  ;;  %s3171_s25 = scalar_lea.vmem %s2217_s24, 4096  ;;  %p3176_p1 = scmp.lt.s32.totalorder %s2217_s24, %s2217_s24 }
 0x1aa   :  { %v2884_v17 = vpop.f32.mrf.mxu1  ;;  %p3172_p0 = scmp.ne.s32.totalorder %s2217_s24, %s3171_s25  ;;  %p3177_p2 = scmp.lt.s32.totalorder %s3171_s25, %s3171_s25 }
 0x1ab   :  { %v1093_v18 = vmax.bf16 %v3193_v54, %v1061_v16  ;;  %3021 = vmatpush3.bf16.msra.mxu0 %v3166_v58 }
 0x1ac   :  { %v850_v20 = vpop.f32.mrf.mxu1  ;;  %3022 = vmatprep.subr.bf16.mxu0 %v3167_v62  ;;  %p3178_p3 = por %p3177_p2, %p3176_p1 }
 0x1ad   :  { %2958 = vmatprep.mubr.bf16.mxu0 %v1093_v18 }
 0x1ae   :  { %v2885_v21 = vpop.f32.mrf.mxu1  ;;  %2959 = vmatmul.mubr.bf16.gmra.mxu0 %v1094_v19  ;;  %p3179_p4 = pnand %p3178_p3, %p3172_p0 }
 0x1af   :  { %3023 = vmatpush3.bf16.msra.mxu0 %v3167_v62  ;;  %v1064_v22 = vpack.c.bf16 %v2885_v21, %v2884_v17 }
 0x1b0   :  { %v853_v23 = vpop.f32.mrf.mxu1  ;;  %3024 = vmatprep.subr.bf16.mxu0 %v3168_v3 }
 0x1b1   :  { %v1063_v24 = vpack.c.bf16 %v853_v23, %v850_v20  ;;  %v1096_v27 = vmax.bf16 %v3193_v54, %v1064_v22 }
 0x1b2   :  { %v2888_v25 = vpop.f32.mrf.mxu1 }
 0x1b3   :  { %v1095_v26 = vmax.bf16 %v3193_v54, %v1063_v24  ;;  %3025 = vmatpush3.bf16.msra.mxu0 %v3168_v3 }
 0x1b4   :  { %v866_v28 = vpop.f32.mrf.mxu1  ;;  %3026 = vmatprep.subr.bf16.mxu0 %v3169_v8 }
 0x1b5   :  { %2962 = vmatprep.mubr.bf16.mxu0 %v1095_v26 }
 0x1b6   :  { %v2889_v29 = vpop.f32.mrf.mxu1  ;;  %2963 = vmatmul.mubr.bf16.gmra.mxu0 %v1096_v27 }
 0x1b7   :  { %3027 = vmatpush3.bf16.msra.mxu0 %v3169_v8  ;;  %v1066_v30 = vpack.c.bf16 %v2889_v29, %v2888_v25 }
 0x1b8   :  { %v869_v31 = vpop.f32.mrf.mxu1  ;;  %3028 = vmatprep.subr.bf16.mxu0 %v3170_v9 }
 0x1b9   :  { %v1065_v32 = vpack.c.bf16 %v869_v31, %v866_v28  ;;  %v1098_v35 = vmax.bf16 %v3193_v54, %v1066_v30 }
 0x1ba   :  { %v2892_v33 = vpop.f32.mrf.mxu1 }
 0x1bb   :  { %v1097_v34 = vmax.bf16 %v3193_v54, %v1065_v32  ;;  %3029 = vmatpush3.bf16.msra.mxu0 %v3170_v9 }
 0x1bc   :  { %v882_v36 = vpop.f32.mrf.mxu1 }
 0x1bd   :  { %2966 = vmatprep.mubr.bf16.mxu0 %v1097_v34 }
 0x1be   :  { %v2893_v37 = vpop.f32.mrf.mxu1  ;;  %2967 = vmatmul.mubr.bf16.gmra.mxu0 %v1098_v35 }
 0x1bf   :  { %v1068_v38 = vpack.c.bf16 %v2893_v37, %v2892_v33 }
 0x1c0   :  { %v885_v39 = vpop.f32.mrf.mxu1 }
 0x1c1   :  { %v1067_v40 = vpack.c.bf16 %v885_v39, %v882_v36  ;;  %v1100_v43 = vmax.bf16 %v3193_v54, %v1068_v38 }
 0x1c2   :  { %v2896_v41 = vpop.f32.mrf.mxu1 }
 0x1c3   :  { %v1099_v42 = vmax.bf16 %v3193_v54, %v1067_v40 }
 0x1c4   :  { %v898_v44 = vpop.f32.mrf.mxu1 }
 0x1c5   :  { %2970 = vmatprep.mubr.bf16.mxu0 %v1099_v42 }
 0x1c6   :  { %v2897_v45 = vpop.f32.mrf.mxu1  ;;  %2971 = vmatmul.mubr.bf16.gmra.mxu0 %v1100_v43 }
 0x1c7   :  { %v1070_v46 = vpack.c.bf16 %v2897_v45, %v2896_v41 }
 0x1c8   :  { %v901_v47 = vpop.f32.mrf.mxu1 }
 0x1c9   :  { %v1069_v48 = vpack.c.bf16 %v901_v47, %v898_v44  ;;  %v1102_v51 = vmax.bf16 %v3193_v54, %v1070_v46 }
 0x1ca   :  { %v2900_v49 = vpop.f32.mrf.mxu1 }
 0x1cb   :  { %v1101_v50 = vmax.bf16 %v3193_v54, %v1069_v48 }
 0x1cc   :  { %v914_v52 = vpop.f32.mrf.mxu1 }
 0x1cd   :  { %2974 = vmatprep.mubr.bf16.mxu0 %v1101_v50 }
 0x1ce   :  { %v2901_v53 = vpop.f32.mrf.mxu1  ;;  %2975 = vmatmul.mubr.bf16.gmra.mxu0 %v1102_v51 }
 0x1cf   :  { %v1072_v55 = vpack.c.bf16 %v2901_v53, %v2900_v49 }
 0x1d0   :  { %v917_v56 = vpop.f32.mrf.mxu1 }
 0x1d1   :  { %v1071_v57 = vpack.c.bf16 %v917_v56, %v914_v52  ;;  %v1104_v60 = vmax.bf16 %v3193_v54, %v1072_v55 }
 0x1d2   :  { %v2904_v58 = vpop.f32.mrf.mxu1 }
 0x1d3   :  { %v1103_v59 = vmax.bf16 %v3193_v54, %v1071_v57 }
 0x1d4   :  { %v930_v61 = vpop.f32.mrf.mxu1 }
 0x1d5   :  { %2978 = vmatprep.mubr.bf16.mxu0 %v1103_v59 }
 0x1d6   :  { %v2905_v62 = vpop.f32.mrf.mxu1  ;;  %2979 = vmatmul.mubr.bf16.gmra.mxu0 %v1104_v60 }
 0x1d7   :  { %v1074_v63 = vpack.c.bf16 %v2905_v62, %v2904_v58 }
 0x1d8   :  { %v933_v0 = vpop.f32.mrf.mxu1 }
 0x1d9   :  { %v1073_v1 = vpack.c.bf16 %v933_v0, %v930_v61  ;;  %v1106_v4 = vmax.bf16 %v3193_v54, %v1074_v63 }
 0x1da   :  { %v2908_v2 = vpop.f32.mrf.mxu1 }
 0x1db   :  { %v1105_v3 = vmax.bf16 %v3193_v54, %v1073_v1 }
 0x1dc   :  { %v946_v5 = vpop.f32.mrf.mxu1 }
 0x1dd   :  { %2982 = vmatprep.mubr.bf16.mxu0 %v1105_v3 }
 0x1de   :  { %v2909_v6 = vpop.f32.mrf.mxu1  ;;  %2983 = vmatmul.mubr.bf16.gmra.mxu0 %v1106_v4 }
 0x1df   :  { %v1076_v7 = vpack.c.bf16 %v2909_v6, %v2908_v2 }
 0x1e0   :  { %v949_v8 = vpop.f32.mrf.mxu1 }
 0x1e1   :  { %v1075_v10 = vpack.c.bf16 %v949_v8, %v946_v5  ;;  %v1108_v13 = vmax.bf16 %v3193_v54, %v1076_v7 }
 0x1e2   :  { %v2912_v11 = vpop.f32.mrf.mxu1 }
 0x1e3   :  { %v1107_v12 = vmax.bf16 %v3193_v54, %v1075_v10 }
 0x1e4   :  { %v962_v14 = vpop.f32.mrf.mxu1 }
 0x1e5   :  { %2986 = vmatprep.mubr.bf16.mxu0 %v1107_v12 }
 0x1e6   :  { %v2913_v15 = vpop.f32.mrf.mxu1  ;;  %2987 = vmatmul.mubr.bf16.gmra.mxu0 %v1108_v13 }
 0x1e7   :  { %v1078_v16 = vpack.c.bf16 %v2913_v15, %v2912_v11 }
 0x1e8   :  { %v965_v17 = vpop.f32.mrf.mxu1 }
 0x1e9   :  { %v1077_v18 = vpack.c.bf16 %v965_v17, %v962_v14  ;;  %v1110_v21 = vmax.bf16 %v3193_v54, %v1078_v16 }
 0x1ea   :  { %v2916_v19 = vpop.f32.mrf.mxu1 }
 0x1eb   :  { %v1109_v20 = vmax.bf16 %v3193_v54, %v1077_v18 }
 0x1ec   :  { %v978_v22 = vpop.f32.mrf.mxu1 }
 0x1ed   :  { %2990 = vmatprep.mubr.bf16.mxu0 %v1109_v20 }
 0x1ee   :  { %v2917_v23 = vpop.f32.mrf.mxu1  ;;  %2991 = vmatmul.mubr.bf16.gmra.mxu0 %v1110_v21 }
 0x1ef   :  { %v1080_v24 = vpack.c.bf16 %v2917_v23, %v2916_v19 }
 0x1f0   :  { %v981_v25 = vpop.f32.mrf.mxu1 }
 0x1f1   :  { %v1079_v26 = vpack.c.bf16 %v981_v25, %v978_v22  ;;  %v1112_v29 = vmax.bf16 %v3193_v54, %v1080_v24 }
 0x1f2   :  { %v2920_v27 = vpop.f32.mrf.mxu1 }
 0x1f3   :  { %v1111_v28 = vmax.bf16 %v3193_v54, %v1079_v26 }
 0x1f4   :  { %v994_v30 = vpop.f32.mrf.mxu1 }
 0x1f5   :  { %2994 = vmatprep.mubr.bf16.mxu0 %v1111_v28 }
 0x1f6   :  { %v2921_v31 = vpop.f32.mrf.mxu1  ;;  %2995 = vmatmul.mubr.bf16.gmra.mxu0 %v1112_v29 }
 0x1f7   :  { %v1082_v32 = vpack.c.bf16 %v2921_v31, %v2920_v27 }
 0x1f8   :  { %v997_v33 = vpop.f32.mrf.mxu1 }
 0x1f9   :  { %v1081_v34 = vpack.c.bf16 %v997_v33, %v994_v30  ;;  %v1114_v37 = vmax.bf16 %v3193_v54, %v1082_v32 }
 0x1fa   :  { %v2924_v35 = vpop.f32.mrf.mxu1 }
 0x1fb   :  { %v1113_v36 = vmax.bf16 %v3193_v54, %v1081_v34 }
 0x1fc   :  { %v1010_v38 = vpop.f32.mrf.mxu1 }
 0x1fd   :  { %2998 = vmatprep.mubr.bf16.mxu0 %v1113_v36 }
 0x1fe   :  { %v2925_v39 = vpop.f32.mrf.mxu1  ;;  %2999 = vmatmul.mubr.bf16.gmra.mxu0 %v1114_v37 }
 0x1ff   :  { %v1084_v40 = vpack.c.bf16 %v2925_v39, %v2924_v35 }
 0x200   :  { %v1013_v41 = vpop.f32.mrf.mxu1 }
 0x201   :  { %v1083_v42 = vpack.c.bf16 %v1013_v41, %v1010_v38  ;;  %v1116_v45 = vmax.bf16 %v3193_v54, %v1084_v40 }
 0x202   :  { %v2928_v43 = vpop.f32.mrf.mxu1 }
 0x203   :  { %v1115_v44 = vmax.bf16 %v3193_v54, %v1083_v42 }
 0x204   :  { %v1026_v46 = vpop.f32.mrf.mxu1 }
 0x205   :  { %3002 = vmatprep.mubr.bf16.mxu0 %v1115_v44 }
 0x206   :  { %v2929_v47 = vpop.f32.mrf.mxu1  ;;  %3003 = vmatmul.mubr.bf16.gmra.mxu0 %v1116_v45 }
 0x207   :  { %v1086_v48 = vpack.c.bf16 %v2929_v47, %v2928_v43 }
 0x208   :  { %v1029_v49 = vpop.f32.mrf.mxu1 }
 0x209   :  { %v1085_v50 = vpack.c.bf16 %v1029_v49, %v1026_v46  ;;  %v1118_v53 = vmax.bf16 %v3193_v54, %v1086_v48 }
 0x20a   :  { %v2932_v51 = vpop.f32.mrf.mxu1 }
 0x20b   :  { %v1117_v52 = vmax.bf16 %v3193_v54, %v1085_v50 }
 0x20c   :  { %v1042_v55 = vpop.f32.mrf.mxu1 }
 0x20d   :  { %3006 = vmatprep.mubr.bf16.mxu0 %v1117_v52 }
 0x20e   :  { %v2933_v56 = vpop.f32.mrf.mxu1  ;;  %3007 = vmatmul.mubr.bf16.gmra.mxu0 %v1118_v53 }
 0x20f   :  { %v1088_v57 = vpack.c.bf16 %v2933_v56, %v2932_v51 }
 0x210   :  { %v1045_v58 = vpop.f32.mrf.mxu1 }
 0x211   :  { %v1087_v59 = vpack.c.bf16 %v1045_v58, %v1042_v55  ;;  %v1120_v61 = vmax.bf16 %v3193_v54, %v1088_v57 }
 0x213   :  { %v1119_v60 = vmax.bf16 %v3193_v54, %v1087_v59 }
 0x215   :  { %3010 = vmatprep.mubr.bf16.mxu0 %v1119_v60 }
 0x216   :  { %3011 = vmatmul.mubr.bf16.gmra.mxu0 %v1120_v61 }
 0x25e   :  { %v2952_v62 = vpop.f32.mrf.mxu0 }
 0x260   :  { %v1219_v63 = vpop.f32.mrf.mxu0 }
 0x262   :  { %v2953_v0 = vpop.f32.mrf.mxu0 }
 0x263   :  { %v1475_v1 = vpack.c.bf16 %v2953_v0, %v2952_v62 }
 0x264   :  { %v1222_v2 = vpop.f32.mrf.mxu0 }
 0x265   :  { %v1474_v3 = vpack.c.bf16 %v1222_v2, %v1219_v63  ;;  %v1507_v6 = vmax.bf16 %v3193_v54, %v1475_v1 }
 0x266   :  { %v2956_v4 = vpop.f32.mrf.mxu0 }
 0x267   :  { %v1506_v5 = vmax.bf16 %v3193_v54, %v1474_v3 }
 0x268   :  { %v1235_v7 = vpop.f32.mrf.mxu0 }
 0x269   :  { %3030 = vmatprep.mubr.bf16.mxu0 %v1506_v5 }
 0x26a   :  { %v2957_v8 = vpop.f32.mrf.mxu0  ;;  %3031 = vmatmul.mubr.bf16.vlgmr.msra.gmra.mxu0 %v1507_v6 }
 0x26b   :  { %v1477_v9 = vpack.c.bf16 %v2957_v8, %v2956_v4 }
 0x26c   :  { %v1238_v10 = vpop.f32.mrf.mxu0 }
 0x26d   :  { %v1476_v11 = vpack.c.bf16 %v1238_v10, %v1235_v7  ;;  %v1509_v14 = vmax.bf16 %v3193_v54, %v1477_v9 }
 0x26e   :  { %v2960_v12 = vpop.f32.mrf.mxu0 }
 0x26f   :  { %v1508_v13 = vmax.bf16 %v3193_v54, %v1476_v11 }
 0x270   :  { %v1251_v15 = vpop.f32.mrf.mxu0 }
 0x271   :  { %3034 = vmatprep.mubr.bf16.mxu1 %v1508_v13 }
 0x272   :  { %v2961_v16 = vpop.f32.mrf.mxu0  ;;  %3035 = vmatmul.mubr.bf16.vlgmr.msra.gmra.mxu1 %v1509_v14 }
 0x273   :  { %v1479_v17 = vpack.c.bf16 %v2961_v16, %v2960_v12 }
 0x274   :  { %v1254_v18 = vpop.f32.mrf.mxu0 }
 0x275   :  { %v1478_v19 = vpack.c.bf16 %v1254_v18, %v1251_v15  ;;  %v1511_v22 = vmax.bf16 %v3193_v54, %v1479_v17 }
 0x276   :  { %v2964_v20 = vpop.f32.mrf.mxu0 }
 0x277   :  { %v1510_v21 = vmax.bf16 %v3193_v54, %v1478_v19 }
 0x278   :  { %v1267_v23 = vpop.f32.mrf.mxu0 }
 0x279   :  { %3038 = vmatprep.mubr.bf16.mxu1 %v1510_v21 }
 0x27a   :  { %v2965_v24 = vpop.f32.mrf.mxu0  ;;  %3039 = vmatmul.mubr.bf16.gmra.mxu1 %v1511_v22 }
 0x27b   :  { %v1481_v25 = vpack.c.bf16 %v2965_v24, %v2964_v20 }
 0x27c   :  { %v1270_v26 = vpop.f32.mrf.mxu0 }
 0x27d   :  { %v1480_v27 = vpack.c.bf16 %v1270_v26, %v1267_v23  ;;  %v1513_v30 = vmax.bf16 %v3193_v54, %v1481_v25 }
 0x27e   :  { %v2968_v28 = vpop.f32.mrf.mxu0 }
 0x27f   :  { %v1512_v29 = vmax.bf16 %v3193_v54, %v1480_v27 }
 0x280   :  { %v1283_v31 = vpop.f32.mrf.mxu0 }
 0x281   :  { %3042 = vmatprep.mubr.bf16.mxu1 %v1512_v29 }
 0x282   :  { %v2969_v32 = vpop.f32.mrf.mxu0  ;;  %3043 = vmatmul.mubr.bf16.gmra.mxu1 %v1513_v30 }
 0x283   :  { %v1483_v33 = vpack.c.bf16 %v2969_v32, %v2968_v28 }
 0x284   :  { %v1286_v34 = vpop.f32.mrf.mxu0 }
 0x285   :  { %v1482_v35 = vpack.c.bf16 %v1286_v34, %v1283_v31  ;;  %v1515_v38 = vmax.bf16 %v3193_v54, %v1483_v33 }
 0x286   :  { %v2972_v36 = vpop.f32.mrf.mxu0 }
 0x287   :  { %v1514_v37 = vmax.bf16 %v3193_v54, %v1482_v35 }
 0x288   :  { %v1299_v39 = vpop.f32.mrf.mxu0 }
 0x289   :  { %3046 = vmatprep.mubr.bf16.mxu1 %v1514_v37 }
 0x28a   :  { %v2973_v40 = vpop.f32.mrf.mxu0  ;;  %3047 = vmatmul.mubr.bf16.gmra.mxu1 %v1515_v38 }
 0x28b   :  { %v1485_v41 = vpack.c.bf16 %v2973_v40, %v2972_v36 }
 0x28c   :  { %v1302_v42 = vpop.f32.mrf.mxu0 }
 0x28d   :  { %v1484_v43 = vpack.c.bf16 %v1302_v42, %v1299_v39  ;;  %v1517_v46 = vmax.bf16 %v3193_v54, %v1485_v41 }
 0x28e   :  { %v2976_v44 = vpop.f32.mrf.mxu0 }
 0x28f   :  { %v1516_v45 = vmax.bf16 %v3193_v54, %v1484_v43 }
 0x290   :  { %v1315_v47 = vpop.f32.mrf.mxu0 }
 0x291   :  { %3050 = vmatprep.mubr.bf16.mxu1 %v1516_v45 }
 0x292   :  { %v2977_v48 = vpop.f32.mrf.mxu0  ;;  %3051 = vmatmul.mubr.bf16.gmra.mxu1 %v1517_v46 }
 0x293   :  { %v1487_v49 = vpack.c.bf16 %v2977_v48, %v2976_v44 }
 0x294   :  { %v1318_v50 = vpop.f32.mrf.mxu0 }
 0x295   :  { %v1486_v51 = vpack.c.bf16 %v1318_v50, %v1315_v47  ;;  %v1519_v55 = vmax.bf16 %v3193_v54, %v1487_v49 }
 0x296   :  { %v2980_v52 = vpop.f32.mrf.mxu0 }
 0x297   :  { %v1518_v53 = vmax.bf16 %v3193_v54, %v1486_v51 }
 0x298   :  { %v1331_v56 = vpop.f32.mrf.mxu0 }
 0x299   :  { %3054 = vmatprep.mubr.bf16.mxu1 %v1518_v53 }
 0x29a   :  { %v2981_v57 = vpop.f32.mrf.mxu0  ;;  %3055 = vmatmul.mubr.bf16.gmra.mxu1 %v1519_v55 }
 0x29b   :  { %v1489_v58 = vpack.c.bf16 %v2981_v57, %v2980_v52 }
 0x29c   :  { %v1334_v59 = vpop.f32.mrf.mxu0 }
 0x29d   :  { %v1488_v60 = vpack.c.bf16 %v1334_v59, %v1331_v56  ;;  %v1521_v63 = vmax.bf16 %v3193_v54, %v1489_v58 }
 0x29e   :  { %v2984_v61 = vpop.f32.mrf.mxu0 }
 0x29f   :  { %v1520_v62 = vmax.bf16 %v3193_v54, %v1488_v60 }
 0x2a0   :  { %v1347_v0 = vpop.f32.mrf.mxu0 }
 0x2a1   :  { %3058 = vmatprep.mubr.bf16.mxu1 %v1520_v62 }
 0x2a2   :  { %v2985_v1 = vpop.f32.mrf.mxu0  ;;  %3059 = vmatmul.mubr.bf16.gmra.mxu1 %v1521_v63 }
 0x2a3   :  { %v1491_v2 = vpack.c.bf16 %v2985_v1, %v2984_v61 }
 0x2a4   :  { %v1350_v3 = vpop.f32.mrf.mxu0 }
 0x2a5   :  { %v1490_v4 = vpack.c.bf16 %v1350_v3, %v1347_v0  ;;  %v1523_v7 = vmax.bf16 %v3193_v54, %v1491_v2 }
 0x2a6   :  { %v2988_v5 = vpop.f32.mrf.mxu0 }
 0x2a7   :  { %v1522_v6 = vmax.bf16 %v3193_v54, %v1490_v4 }
 0x2a8   :  { %v1363_v8 = vpop.f32.mrf.mxu0 }
 0x2a9   :  { %3062 = vmatprep.mubr.bf16.mxu1 %v1522_v6 }
 0x2aa   :  { %v2989_v9 = vpop.f32.mrf.mxu0  ;;  %3063 = vmatmul.mubr.bf16.gmra.mxu1 %v1523_v7 }
 0x2ab   :  { %v1493_v10 = vpack.c.bf16 %v2989_v9, %v2988_v5 }
 0x2ac   :  { %v1366_v11 = vpop.f32.mrf.mxu0 }
 0x2ad   :  { %v1492_v12 = vpack.c.bf16 %v1366_v11, %v1363_v8  ;;  %v1525_v15 = vmax.bf16 %v3193_v54, %v1493_v10 }
 0x2ae   :  { %v2992_v13 = vpop.f32.mrf.mxu0 }
 0x2af   :  { %v1524_v14 = vmax.bf16 %v3193_v54, %v1492_v12 }
 0x2b0   :  { %v1379_v16 = vpop.f32.mrf.mxu0 }
 0x2b1   :  { %3066 = vmatprep.mubr.bf16.mxu1 %v1524_v14 }
 0x2b2   :  { %v2993_v17 = vpop.f32.mrf.mxu0  ;;  %3067 = vmatmul.mubr.bf16.gmra.mxu1 %v1525_v15 }
 0x2b3   :  { %v1495_v18 = vpack.c.bf16 %v2993_v17, %v2992_v13 }
 0x2b4   :  { %v1382_v19 = vpop.f32.mrf.mxu0 }
 0x2b5   :  { %v1494_v20 = vpack.c.bf16 %v1382_v19, %v1379_v16  ;;  %v1527_v23 = vmax.bf16 %v3193_v54, %v1495_v18 }
 0x2b6   :  { %v2996_v21 = vpop.f32.mrf.mxu0 }
 0x2b7   :  { %v1526_v22 = vmax.bf16 %v3193_v54, %v1494_v20 }
 0x2b8   :  { %v1395_v24 = vpop.f32.mrf.mxu0 }
 0x2b9   :  { %3070 = vmatprep.mubr.bf16.mxu1 %v1526_v22 }
 0x2ba   :  { %v2997_v25 = vpop.f32.mrf.mxu0  ;;  %3071 = vmatmul.mubr.bf16.gmra.mxu1 %v1527_v23 }
 0x2bb   :  { %v1497_v26 = vpack.c.bf16 %v2997_v25, %v2996_v21 }
 0x2bc   :  { %v1398_v27 = vpop.f32.mrf.mxu0 }
 0x2bd   :  { %v1496_v28 = vpack.c.bf16 %v1398_v27, %v1395_v24  ;;  %v1529_v31 = vmax.bf16 %v3193_v54, %v1497_v26 }
 0x2be   :  { %v3000_v29 = vpop.f32.mrf.mxu0 }
 0x2bf   :  { %v1528_v30 = vmax.bf16 %v3193_v54, %v1496_v28 }
 0x2c0   :  { %v1411_v32 = vpop.f32.mrf.mxu0 }
 0x2c1   :  { %3074 = vmatprep.mubr.bf16.mxu1 %v1528_v30 }
 0x2c2   :  { %v3001_v33 = vpop.f32.mrf.mxu0  ;;  %3075 = vmatmul.mubr.bf16.gmra.mxu1 %v1529_v31 }
 0x2c3   :  { %v1499_v34 = vpack.c.bf16 %v3001_v33, %v3000_v29 }
 0x2c4   :  { %v1414_v35 = vpop.f32.mrf.mxu0 }
 0x2c5   :  { %v1498_v36 = vpack.c.bf16 %v1414_v35, %v1411_v32  ;;  %v1531_v39 = vmax.bf16 %v3193_v54, %v1499_v34 }
 0x2c6   :  { %v3004_v37 = vpop.f32.mrf.mxu0 }
 0x2c7   :  { %v1530_v38 = vmax.bf16 %v3193_v54, %v1498_v36 }
 0x2c8   :  { %v1427_v40 = vpop.f32.mrf.mxu0 }
 0x2c9   :  { %3078 = vmatprep.mubr.bf16.mxu1 %v1530_v38 }
 0x2ca   :  { %v3005_v41 = vpop.f32.mrf.mxu0  ;;  %3079 = vmatmul.mubr.bf16.gmra.mxu1 %v1531_v39 }
 0x2cb   :  { %v1501_v42 = vpack.c.bf16 %v3005_v41, %v3004_v37 }
 0x2cc   :  { %v1430_v43 = vpop.f32.mrf.mxu0 }
 0x2cd   :  { %v1500_v44 = vpack.c.bf16 %v1430_v43, %v1427_v40  ;;  %v1533_v47 = vmax.bf16 %v3193_v54, %v1501_v42 }
 0x2ce   :  { %v3008_v45 = vpop.f32.mrf.mxu0 }
 0x2cf   :  { %v1532_v46 = vmax.bf16 %v3193_v54, %v1500_v44 }
 0x2d0   :  { %v1443_v48 = vpop.f32.mrf.mxu0 }
 0x2d1   :  { %3082 = vmatprep.mubr.bf16.mxu1 %v1532_v46 }
 0x2d2   :  { %v3009_v49 = vpop.f32.mrf.mxu0  ;;  %3083 = vmatmul.mubr.bf16.gmra.mxu1 %v1533_v47 }
 0x2d3   :  { %v1503_v50 = vpack.c.bf16 %v3009_v49, %v3008_v45 }
 0x2d4   :  { %v1446_v51 = vpop.f32.mrf.mxu0 }
 0x2d5   :  { %v1502_v52 = vpack.c.bf16 %v1446_v51, %v1443_v48  ;;  %v1535_v56 = vmax.bf16 %v3193_v54, %v1503_v50 }
 0x2d6   :  { %v3012_v53 = vpop.f32.mrf.mxu0 }
 0x2d7   :  { %v1534_v55 = vmax.bf16 %v3193_v54, %v1502_v52 }
 0x2d8   :  { %v1459_v57 = vpop.f32.mrf.mxu0 }
 0x2d9   :  { %3086 = vmatprep.mubr.bf16.mxu1 %v1534_v55 }
 0x2da   :  { %v3013_v58 = vpop.f32.mrf.mxu0  ;;  %3087 = vmatmul.mubr.bf16.gmra.mxu1 %v1535_v56 }
 0x2db   :  { %v1505_v59 = vpack.c.bf16 %v3013_v58, %v3012_v53 }
 0x2dc   :  { %v1462_v60 = vpop.f32.mrf.mxu0 }
 0x2dd   :  { %v1504_v61 = vpack.c.bf16 %v1462_v60, %v1459_v57  ;;  %v1537_v63 = vmax.bf16 %v3193_v54, %v1505_v59 }
 0x2df   :  { %v1536_v62 = vmax.bf16 %v3193_v54, %v1504_v61 }
 0x2e1   :  { %3090 = vmatprep.mubr.bf16.mxu1 %v1536_v62 }
 0x2e2   :  { %3091 = vmatmul.mubr.bf16.gmra.mxu1 %v1537_v63 }
 0x32a   :  { %v3032_v0 = vpop.f32.mrf.mxu0 }
 0x32c   :  { %v1636_v1 = vpop.f32.mrf.mxu0 }
 0x32e   :  { %v3033_v2 = vpop.f32.mrf.mxu0 }
 0x32f   :  { %v2452_v3 = vpack.c.bf16 %v3033_v2, %v3032_v0 }
 0x330   :  { %v1639_v4 = vpop.f32.mrf.mxu0 }
 0x331   :  { %2604 = vst [vmem:[#allocation2 + $0x8] sm:$0xff] %v2452_v3   ;;  %v2447_v5 = vpack.c.bf16 %v1639_v4, %v1636_v1 }
 0x332   :  { %v3036_v6 = vpop.f32.mrf.mxu1 }
 0x333   :  { %2448 = vst [vmem:[#allocation2] sm:$0xff] %v2447_v5  }
 0x334   :  { %v1652_v7 = vpop.f32.mrf.mxu1 }
 0x336   :  { %v3037_v8 = vpop.f32.mrf.mxu1 }
 0x337   :  { %v2462_v9 = vpack.c.bf16 %v3037_v8, %v3036_v6 }
 0x338   :  { %v1655_v10 = vpop.f32.mrf.mxu1 }
 0x339   :  { %2606 = vst [vmem:[#allocation2 + $0x18] sm:$0xff] %v2462_v9   ;;  %v2457_v11 = vpack.c.bf16 %v1655_v10, %v1652_v7 }
 0x33a   :  { %v3040_v12 = vpop.f32.mrf.mxu1 }
 0x33b   :  { %2605 = vst [vmem:[#allocation2 + $0x10] sm:$0xff] %v2457_v11  }
 0x33c   :  { %v1668_v54 = vpop.f32.mrf.mxu1 }
 0x33e   :  { %v3041_v13 = vpop.f32.mrf.mxu1 }
 0x33f   :  { %v2472_v14 = vpack.c.bf16 %v3041_v13, %v3040_v12 }
 0x340   :  { %v1671_v15 = vpop.f32.mrf.mxu1 }
 0x341   :  { %2608 = vst [vmem:[#allocation2 + $0x28] sm:$0xff] %v2472_v14   ;;  %v2467_v16 = vpack.c.bf16 %v1671_v15, %v1668_v54 }
 0x342   :  { %v3044_v17 = vpop.f32.mrf.mxu1 }
 0x343   :  { %2607 = vst [vmem:[#allocation2 + $0x20] sm:$0xff] %v2467_v16  }
 0x344   :  { %v1684_v18 = vpop.f32.mrf.mxu1 }
 0x346   :  { %v3045_v19 = vpop.f32.mrf.mxu1 }
 0x347   :  { %v2482_v20 = vpack.c.bf16 %v3045_v19, %v3044_v17 }
 0x348   :  { %v1687_v21 = vpop.f32.mrf.mxu1 }
 0x349   :  { %2610 = vst [vmem:[#allocation2 + $0x38] sm:$0xff] %v2482_v20   ;;  %v2477_v22 = vpack.c.bf16 %v1687_v21, %v1684_v18 }
 0x34a   :  { %v3048_v23 = vpop.f32.mrf.mxu1 }
 0x34b   :  { %2609 = vst [vmem:[#allocation2 + $0x30] sm:$0xff] %v2477_v22  }
 0x34c   :  { %v1700_v24 = vpop.f32.mrf.mxu1 }
 0x34e   :  { %v3049_v25 = vpop.f32.mrf.mxu1 }
 0x34f   :  { %v2492_v26 = vpack.c.bf16 %v3049_v25, %v3048_v23 }
 0x350   :  { %v1703_v27 = vpop.f32.mrf.mxu1 }
 0x351   :  { %2612 = vst [vmem:[#allocation2 + $0x48] sm:$0xff] %v2492_v26   ;;  %v2487_v28 = vpack.c.bf16 %v1703_v27, %v1700_v24 }
 0x352   :  { %v3052_v29 = vpop.f32.mrf.mxu1 }
 0x353   :  { %2611 = vst [vmem:[#allocation2 + $0x40] sm:$0xff] %v2487_v28  }
 0x354   :  { %v1716_v30 = vpop.f32.mrf.mxu1 }
 0x356   :  { %v3053_v31 = vpop.f32.mrf.mxu1 }
 0x357   :  { %v2502_v32 = vpack.c.bf16 %v3053_v31, %v3052_v29 }
 0x358   :  { %v1719_v33 = vpop.f32.mrf.mxu1 }
 0x359   :  { %2614 = vst [vmem:[#allocation2 + $0x58] sm:$0xff] %v2502_v32   ;;  %v2497_v34 = vpack.c.bf16 %v1719_v33, %v1716_v30 }
 0x35a   :  { %v3056_v35 = vpop.f32.mrf.mxu1 }
 0x35b   :  { %2613 = vst [vmem:[#allocation2 + $0x50] sm:$0xff] %v2497_v34  }
 0x35c   :  { %v1732_v36 = vpop.f32.mrf.mxu1 }
 0x35e   :  { %v3057_v37 = vpop.f32.mrf.mxu1 }
 0x35f   :  { %v2512_v38 = vpack.c.bf16 %v3057_v37, %v3056_v35 }
 0x360   :  { %v1735_v39 = vpop.f32.mrf.mxu1 }
 0x361   :  { %2616 = vst [vmem:[#allocation2 + $0x68] sm:$0xff] %v2512_v38   ;;  %v2507_v40 = vpack.c.bf16 %v1735_v39, %v1732_v36 }
 0x362   :  { %v3060_v41 = vpop.f32.mrf.mxu1 }
 0x363   :  { %2615 = vst [vmem:[#allocation2 + $0x60] sm:$0xff] %v2507_v40  }
 0x364   :  { %v1748_v42 = vpop.f32.mrf.mxu1 }
 0x366   :  { %v3061_v43 = vpop.f32.mrf.mxu1 }
 0x367   :  { %v2522_v44 = vpack.c.bf16 %v3061_v43, %v3060_v41 }
 0x368   :  { %v1751_v45 = vpop.f32.mrf.mxu1 }
 0x369   :  { %2618 = vst [vmem:[#allocation2 + $0x78] sm:$0xff] %v2522_v44   ;;  %v2517_v46 = vpack.c.bf16 %v1751_v45, %v1748_v42 }
 0x36a   :  { %v3064_v47 = vpop.f32.mrf.mxu1 }
 0x36b   :  { %2617 = vst [vmem:[#allocation2 + $0x70] sm:$0xff] %v2517_v46  }
 0x36c   :  { %v1764_v48 = vpop.f32.mrf.mxu1 }
 0x36e   :  { %v3065_v49 = vpop.f32.mrf.mxu1 }
 0x36f   :  { %v2532_v50 = vpack.c.bf16 %v3065_v49, %v3064_v47 }
 0x370   :  { %v1767_v51 = vpop.f32.mrf.mxu1 }
 0x371   :  { %2620 = vst [vmem:[#allocation2 + $0x88] sm:$0xff] %v2532_v50   ;;  %v2527_v52 = vpack.c.bf16 %v1767_v51, %v1764_v48 }
 0x372   :  { %v3068_v53 = vpop.f32.mrf.mxu1 }
 0x373   :  { %2619 = vst [vmem:[#allocation2 + $0x80] sm:$0xff] %v2527_v52  }
 0x374   :  { %v1780_v55 = vpop.f32.mrf.mxu1 }
 0x376   :  { %v3069_v56 = vpop.f32.mrf.mxu1 }
 0x377   :  { %v2542_v57 = vpack.c.bf16 %v3069_v56, %v3068_v53 }
 0x378   :  { %v1783_v58 = vpop.f32.mrf.mxu1 }
 0x379   :  { %2622 = vst [vmem:[#allocation2 + $0x98] sm:$0xff] %v2542_v57   ;;  %v2537_v59 = vpack.c.bf16 %v1783_v58, %v1780_v55 }
 0x37a   :  { %v3072_v60 = vpop.f32.mrf.mxu1 }
 0x37b   :  { %2621 = vst [vmem:[#allocation2 + $0x90] sm:$0xff] %v2537_v59  }
 0x37c   :  { %v1796_v61 = vpop.f32.mrf.mxu1 }
 0x37e   :  { %v3073_v62 = vpop.f32.mrf.mxu1 }
 0x37f   :  { %v2552_v63 = vpack.c.bf16 %v3073_v62, %v3072_v60 }
 0x380   :  { %v1799_v0 = vpop.f32.mrf.mxu1 }
 0x381   :  { %2624 = vst [vmem:[#allocation2 + $0xa8] sm:$0xff] %v2552_v63   ;;  %v2547_v1 = vpack.c.bf16 %v1799_v0, %v1796_v61 }
 0x382   :  { %v3076_v2 = vpop.f32.mrf.mxu1 }
 0x383   :  { %2623 = vst [vmem:[#allocation2 + $0xa0] sm:$0xff] %v2547_v1  }
 0x384   :  { %v1812_v3 = vpop.f32.mrf.mxu1 }
 0x386   :  { %v3077_v4 = vpop.f32.mrf.mxu1 }
 0x387   :  { %v2562_v5 = vpack.c.bf16 %v3077_v4, %v3076_v2 }
 0x388   :  { %v1815_v6 = vpop.f32.mrf.mxu1 }
 0x389   :  { %2626 = vst [vmem:[#allocation2 + $0xb8] sm:$0xff] %v2562_v5   ;;  %v2557_v7 = vpack.c.bf16 %v1815_v6, %v1812_v3 }
 0x38a   :  { %v3080_v8 = vpop.f32.mrf.mxu1 }
 0x38b   :  { %2625 = vst [vmem:[#allocation2 + $0xb0] sm:$0xff] %v2557_v7  }
 0x38c   :  { %v1828_v9 = vpop.f32.mrf.mxu1 }
 0x38e   :  { %v3081_v10 = vpop.f32.mrf.mxu1 }
 0x38f   :  { %v2572_v11 = vpack.c.bf16 %v3081_v10, %v3080_v8 }
 0x390   :  { %v1831_v12 = vpop.f32.mrf.mxu1 }
 0x391   :  { %2628 = vst [vmem:[#allocation2 + $0xc8] sm:$0xff] %v2572_v11   ;;  %v2567_v54 = vpack.c.bf16 %v1831_v12, %v1828_v9 }
 0x392   :  { %v3084_v13 = vpop.f32.mrf.mxu1 }
 0x393   :  { %2627 = vst [vmem:[#allocation2 + $0xc0] sm:$0xff] %v2567_v54  }
 0x394   :  { %v1844_v14 = vpop.f32.mrf.mxu1 }
 0x396   :  { %v3085_v15 = vpop.f32.mrf.mxu1 }
 0x397   :  { %v2582_v16 = vpack.c.bf16 %v3085_v15, %v3084_v13 }
 0x398   :  { %v1847_v17 = vpop.f32.mrf.mxu1 }
 0x399   :  { %2630 = vst [vmem:[#allocation2 + $0xd8] sm:$0xff] %v2582_v16   ;;  %v2577_v18 = vpack.c.bf16 %v1847_v17, %v1844_v14 }
 0x39a   :  { %v3088_v19 = vpop.f32.mrf.mxu1 }
 0x39b   :  { %2629 = vst [vmem:[#allocation2 + $0xd0] sm:$0xff] %v2577_v18  }
 0x39c   :  { %v1860_v20 = vpop.f32.mrf.mxu1 }
 0x39e   :  { %v3089_v21 = vpop.f32.mrf.mxu1 }
 0x39f   :  { %v2592_v22 = vpack.c.bf16 %v3089_v21, %v3088_v19 }
 0x3a0   :  { %v1863_v23 = vpop.f32.mrf.mxu1 }
 0x3a1   :  { %2632 = vst [vmem:[#allocation2 + $0xe8] sm:$0xff] %v2592_v22   ;;  %v2587_v24 = vpack.c.bf16 %v1863_v23, %v1860_v20 }
 0x3a2   :  { %v3092_v25 = vpop.f32.mrf.mxu1 }
 0x3a3   :  { %2631 = vst [vmem:[#allocation2 + $0xe0] sm:$0xff] %v2587_v24  }
 0x3a4   :  { %v1876_v26 = vpop.f32.mrf.mxu1 }
 0x3a6   :  { %v3093_v27 = vpop.f32.mrf.mxu1 }
 0x3a7   :  { %v2602_v28 = vpack.c.bf16 %v3093_v27, %v3092_v25 }
 0x3a8   :  { %v1879_v29 = vpop.f32.mrf.mxu1 }
 0x3a9   :  { %2634 = vst [vmem:[#allocation2 + $0xf8] sm:$0xff] %v2602_v28   ;;  %v2597_v30 = vpack.c.bf16 %v1879_v29, %v1876_v26 }
 0x3ab   :  { %2633 = vst [vmem:[#allocation2 + $0xf0] sm:$0xff] %v2597_v30  }
 0x3ac   :  { %3182 = shalt.err (!%p3179_p4)
}
 0x3ad   :  { %s3195_s1 = smov 64   ;;  %s3196_s0 = smov 4  }
 0x3ae   :  { %2222 = dma.vmem_to_hbm [thread:$0]  %s2217_s24, 4096, %s3534_s5, [#allocation3], %s3195_s1, %s3195_s1, %s3196_s0  }
 0x3af   :  { %3191 = dma.done.wait [#allocation3], 4096  }
 0x3b0   :  { %3192 = vsyncadd [#allocation3], 4294963200 }
 0x3b1   :  { %2226 = vsyncpa [#allocation3], 1 }

</bundles_post_ra>
